<compile_context>
chip_gen: v7x
topology: tpu7x:2x2x1
jax: 0.10.0
libtpu: 0.0.40
codegen_flags: <defaults>
</compile_context>

<pallas_src>
import jax
import jax.numpy as jnp
from jax.experimental import pallas as pl
from jax.experimental.pallas import tpu as pltpu


# --------------------------------------------------------------------------
# Pallas kernel: single grid step, one W1 matmul and one W2 matmul total.
# --------------------------------------------------------------------------
def _make_odefunc_kernel(S, B, D, H):
    inv_S = 1.0 / S

    def kernel(t_ref,                       # SMEM scalar prefetch, shape (1,)
               x_ref,                       # ((S+1)*B, D) = [y; e_flat]
               w1_ref, b1_ref, g1_ref, w2_ref, b2_ref,
               dy_ref, negdiv_ref):
        t = t_ref[0]                        # scalar from SMEM
        x = x_ref[...]                      # ((S+1)*B, D)
        w1 = w1_ref[...]                    # (D, H)
        w2 = w2_ref[...]                    # (H, D)

        # ---- fused W1 matmul: forward path + all S JVP draws in one push --
        z = jnp.dot(x, w1, preferred_element_type=jnp.float32)  # ((S+1)*B, H)

        # forward path (rows 0:B):  h = tanh(y@W1 + b1 + t*g1)
        pre = z[0:B, :] + b1_ref[...] + t * g1_ref[...]         # (B, H)
        h = jnp.tanh(pre)

        # JVP gate with 1/S pre-folded (removes the final divide).
        gate = (1.0 - h * h) * inv_S                             # (B, H)

        # JVP path (rows B:):  gated_u = (1-h^2)/S * (e @ W1)
        # layout-preserving reshape + broadcast multiply (no sublane concat
        # of S gate copies).
        u = z[B:, :].reshape(S, B, H) * gate[None, :, :]         # (S, B, H)

        # ---- fused W2 matmul: [h; gated_u] @ W2 in one push ---------------
        x2 = jnp.concatenate([h, u.reshape(S * B, H)], axis=0)  # ((S+1)*B, H)
        o2 = jnp.dot(x2, w2, preferred_element_type=jnp.float32)  # ((S+1)*B, D)

        # dy = h @ W2 + b2
        dy_ref[...] = (o2[0:B, :] + b2_ref[...]).astype(dy_ref.dtype)

        # -divergence = -(1/S) * sum_s sum_d e_s * (J e_s)   (1/S already in gate)
        e = x[B:, :]                                             # (S*B, D)
        jv = o2[B:, :]                                           # (S*B, D)
        acc = jnp.sum((e * jv).reshape(S, B, D), axis=0)         # (B, D)
        negdiv_ref[...] = (-jnp.sum(acc, axis=-1, keepdims=True)
                           ).astype(negdiv_ref.dtype)            # (B, 1)

    return kernel


# --------------------------------------------------------------------------
# Wrapper (mirrors ODEfunc.forward with div_method='hutchinson_gauss',
# residual=False).  _num_evals bookkeeping and zeros for states[2:] are glue.
# --------------------------------------------------------------------------
def odefunc_forward(t, states, params, e):
    assert len(states) >= 2
    y = states[0]
    B, D = y.shape
    S = e.shape[0]
    W1, b1, g1, W2, b2 = params
    H = W1.shape[1]

    t_arr = jnp.asarray(t, jnp.float32).reshape(1)      # scalar-prefetch (SMEM)
    # Fold y and all S hutchinson draws into one matmul-M operand: one DMA,
    # one W1 push, M = (S+1)*B rows.
    x = jnp.concatenate([y, e.reshape(S * B, D)], axis=0)   # ((S+1)*B, D)
    M = (S + 1) * B

    kernel = _make_odefunc_kernel(S, B, D, H)

    dy, negdiv = pl.pallas_call(
        kernel,
        out_shape=(jax.ShapeDtypeStruct((B, D), jnp.float32),
                   jax.ShapeDtypeStruct((B, 1), jnp.float32)),
        grid_spec=pltpu.PrefetchScalarGridSpec(
            num_scalar_prefetch=1,                       # t -> SMEM scalar
            grid=(1,),
            in_specs=[
                pl.BlockSpec((M, D), lambda i, t_s: (0, 0)),     # [y; e]
                pl.BlockSpec((D, H), lambda i, t_s: (0, 0)),     # W1
                pl.BlockSpec((1, H), lambda i, t_s: (0, 0)),     # b1
                pl.BlockSpec((1, H), lambda i, t_s: (0, 0)),     # g1
                pl.BlockSpec((H, D), lambda i, t_s: (0, 0)),     # W2
                pl.BlockSpec((1, D), lambda i, t_s: (0, 0)),     # b2
            ],
            out_specs=(pl.BlockSpec((B, D), lambda i, t_s: (0, 0)),
                       pl.BlockSpec((B, 1), lambda i, t_s: (0, 0))),
        ),
        compiler_params=pltpu.CompilerParams(
            dimension_semantics=("arbitrary",)),
    )(t_arr, x, W1, b1, g1, W2, b2)

    # TODO(synk): 'exact_ek' / 'exact_jac' divergence modes (autograd loops)
    # and the residual=True branch are not translated; only the Hutchinson
    # estimator path (gauss / rademacher noise supplied in `e`) is implemented.
    extras = [jnp.zeros_like(s_) for s_ in states[2:]]
    return tuple([dy, negdiv] + extras)


# --------------------------------------------------------------------------
# Pure-JAX reference (exact same math via jax.jvp) for verification
# --------------------------------------------------------------------------
def diffeq_ref(t, y, params):
    W1, b1, g1, W2, b2 = params
    h = jnp.tanh(y @ W1 + b1 + t * g1)
    return h @ W2 + b2


def ref_forward(t, y, e, params):
    dy = diffeq_ref(t, y, params)
    f = lambda x: diffeq_ref(t, x, params)

    def one_draw(es):
        _, jv = jax.jvp(f, (y,), (es,))
        return jnp.sum(es * jv, axis=-1, keepdims=True)

    div = jnp.mean(jax.vmap(one_draw)(e), axis=0)
    return dy, -div


if __name__ == "__main__":
    B, D, H, S = 8, 16, 32, 8   # batch, data dim, hidden dim, hutchinson draws

    key = jax.random.PRNGKey(0)
    k = jax.random.split(key, 8)
    W1 = 0.2 * jax.random.normal(k[0], (D, H), jnp.float32)
    b1 = 0.1 * jax.random.normal(k[1], (1, H), jnp.float32)
    g1 = 0.1 * jax.random.normal(k[2], (1, H), jnp.float32)
    W2 = 0.2 * jax.random.normal(k[3], (H, D), jnp.float32)
    b2 = 0.1 * jax.random.normal(k[4], (1, D), jnp.float32)
    params = (W1, b1, g1, W2, b2)

    y = jax.random.normal(k[5], (B, D), jnp.float32)
    logp = jnp.zeros((B, 1), jnp.float32)
    e = jax.random.normal(k[6], (S, B, D), jnp.float32)   # hutchinson_gauss noise
    t = jnp.float32(0.5)

    out = odefunc_forward(t, (y, logp), params, e)
    out = jax.block_until_ready(out)
    dy, negdiv = out[0], out[1]

    dy_ref, negdiv_ref = ref_forward(t, y, e, params)
    assert jnp.allclose(dy, dy_ref, atol=1e-5, rtol=1e-5), "dy mismatch"
    assert jnp.allclose(negdiv, negdiv_ref, atol=1e-5, rtol=1e-5), "div mismatch"

    print("KERNEL_OK")
</pallas_src>

<mosaic_0001>
module attributes {stable_mosaic.version = 11 : i64} {
  func.func @kernel(%arg0: i32, %arg1: memref<1xf32, #tpu.memory_space<smem>>, %arg2: memref<72x16xf32, #tpu.memory_space<vmem>>, %arg3: memref<16x32xf32, #tpu.memory_space<vmem>>, %arg4: memref<1x32xf32, #tpu.memory_space<vmem>>, %arg5: memref<1x32xf32, #tpu.memory_space<vmem>>, %arg6: memref<32x16xf32, #tpu.memory_space<vmem>>, %arg7: memref<1x16xf32, #tpu.memory_space<vmem>>, %arg8: memref<8x16xf32, #tpu.memory_space<vmem>>, %arg9: memref<8x1xf32, #tpu.memory_space<vmem>>) attributes {dimension_semantics = [#tpu.dimension_semantics<arbitrary>], iteration_bounds = array<i64: 1>, scalar_prefetch = 1 : i64, scratch_operands = 0 : i64, tpu.core_type = #tpu.core_type<tc>, window_params = [{pipeline_mode = #tpu.pipeline_mode<synchronous>, transform_indices = @transform_0, window_bounds = array<i64: 72, 16>}, {pipeline_mode = #tpu.pipeline_mode<synchronous>, transform_indices = @transform_1, window_bounds = array<i64: 16, 32>}, {pipeline_mode = #tpu.pipeline_mode<synchronous>, transform_indices = @transform_2, window_bounds = array<i64: 1, 32>}, {pipeline_mode = #tpu.pipeline_mode<synchronous>, transform_indices = @transform_3, window_bounds = array<i64: 1, 32>}, {pipeline_mode = #tpu.pipeline_mode<synchronous>, transform_indices = @transform_4, window_bounds = array<i64: 32, 16>}, {pipeline_mode = #tpu.pipeline_mode<synchronous>, transform_indices = @transform_5, window_bounds = array<i64: 1, 16>}, {pipeline_mode = #tpu.pipeline_mode<synchronous>, transform_indices = @transform_6, window_bounds = array<i64: 8, 16>}, {pipeline_mode = #tpu.pipeline_mode<synchronous>, transform_indices = @transform_7, window_bounds = array<i64: 8, 1>}]} {
    %c0 = arith.constant 0 : index
    %0 = memref.load %arg1[%c0] : memref<1xf32, #tpu.memory_space<smem>>
    %c0_0 = arith.constant 0 : index
    %c0_1 = arith.constant 0 : index
    %1 = vector.load %arg2[%c0_0, %c0_1] : memref<72x16xf32, #tpu.memory_space<vmem>>, vector<72x16xf32>
    %c0_2 = arith.constant 0 : index
    %c0_3 = arith.constant 0 : index
    %2 = vector.load %arg3[%c0_2, %c0_3] : memref<16x32xf32, #tpu.memory_space<vmem>>, vector<16x32xf32>
    %c0_4 = arith.constant 0 : index
    %c0_5 = arith.constant 0 : index
    %3 = vector.load %arg6[%c0_4, %c0_5] : memref<32x16xf32, #tpu.memory_space<vmem>>, vector<32x16xf32>
    %cst = arith.constant dense<0.000000e+00> : vector<72x32xf32>
    %4 = tpu.matmul %1, %2, %cst {dimension_numbers = #tpu.dot_dimension_numbers<[1], [0], [0], [1], [0, 0, 1, 1], [], []>} : vector<72x16xf32>, vector<16x32xf32>, vector<72x32xf32> -> vector<72x32xf32>
    %5 = vector.extract_strided_slice %4 {offsets = [0, 0], sizes = [8, 32], strides = [1, 1]} : vector<72x32xf32> to vector<8x32xf32>
    %c0_6 = arith.constant 0 : index
    %c0_7 = arith.constant 0 : index
    %6 = vector.load %arg4[%c0_6, %c0_7] : memref<1x32xf32, #tpu.memory_space<vmem>>, vector<1x32xf32>
    %7 = vector.broadcast %6 : vector<1x32xf32> to vector<8x32xf32>
    %8 = arith.addf %5, %7 : vector<8x32xf32>
    %c0_8 = arith.constant 0 : index
    %c0_9 = arith.constant 0 : index
    %9 = vector.load %arg5[%c0_8, %c0_9] : memref<1x32xf32, #tpu.memory_space<vmem>>, vector<1x32xf32>
    %10 = vector.broadcast %0 : f32 to vector<1x32xf32>
    %11 = arith.mulf %10, %9 : vector<1x32xf32>
    %12 = vector.broadcast %11 : vector<1x32xf32> to vector<8x32xf32>
    %13 = arith.addf %8, %12 : vector<8x32xf32>
    %14 = math.tanh %13 : vector<8x32xf32>
    %15 = arith.mulf %14, %14 : vector<8x32xf32>
    %cst_10 = arith.constant 1.000000e+00 : f32
    %16 = vector.broadcast %cst_10 : f32 to vector<8x32xf32>
    %17 = arith.subf %16, %15 : vector<8x32xf32>
    %cst_11 = arith.constant 1.250000e-01 : f32
    %18 = vector.broadcast %cst_11 : f32 to vector<8x32xf32>
    %19 = arith.mulf %17, %18 : vector<8x32xf32>
    %20 = vector.extract_strided_slice %4 {offsets = [8, 0], sizes = [64, 32], strides = [1, 1]} : vector<72x32xf32> to vector<64x32xf32>
    %21 = vector.shape_cast %20 : vector<64x32xf32> to vector<8x8x32xf32>
    %22 = vector.shape_cast %19 : vector<8x32xf32> to vector<1x8x32xf32>
    %23 = vector.broadcast %22 : vector<1x8x32xf32> to vector<8x8x32xf32>
    %24 = arith.mulf %21, %23 : vector<8x8x32xf32>
    %25 = vector.shape_cast %24 : vector<8x8x32xf32> to vector<64x32xf32>
    %26 = tpu.concatenate %14, %25 in 0 : vector<8x32xf32>, vector<64x32xf32> -> vector<72x32xf32>
    %cst_12 = arith.constant dense<0.000000e+00> : vector<72x16xf32>
    %27 = tpu.matmul %26, %3, %cst_12 {dimension_numbers = #tpu.dot_dimension_numbers<[1], [0], [0], [1], [0, 0, 1, 1], [], []>} : vector<72x32xf32>, vector<32x16xf32>, vector<72x16xf32> -> vector<72x16xf32>
    %28 = vector.extract_strided_slice %27 {offsets = [0, 0], sizes = [8, 16], strides = [1, 1]} : vector<72x16xf32> to vector<8x16xf32>
    %c0_13 = arith.constant 0 : index
    %c0_14 = arith.constant 0 : index
    %29 = vector.load %arg7[%c0_13, %c0_14] : memref<1x16xf32, #tpu.memory_space<vmem>>, vector<1x16xf32>
    %30 = vector.broadcast %29 : vector<1x16xf32> to vector<8x16xf32>
    %31 = arith.addf %28, %30 : vector<8x16xf32>
    %c0_15 = arith.constant 0 : index
    %c0_16 = arith.constant 0 : index
    %32 = vector.load %arg8[%c0_15, %c0_16] : memref<8x16xf32, #tpu.memory_space<vmem>>, vector<8x16xf32>
    tpu.vector_store %arg8[%c0_15, %c0_16], %31 {strides = array<i32>} : memref<8x16xf32, #tpu.memory_space<vmem>>, vector<8x16xf32>,
    %33 = vector.extract_strided_slice %1 {offsets = [8, 0], sizes = [64, 16], strides = [1, 1]} : vector<72x16xf32> to vector<64x16xf32>
    %34 = vector.extract_strided_slice %27 {offsets = [8, 0], sizes = [64, 16], strides = [1, 1]} : vector<72x16xf32> to vector<64x16xf32>
    %35 = arith.mulf %33, %34 : vector<64x16xf32>
    %36 = vector.shape_cast %35 : vector<64x16xf32> to vector<8x8x16xf32>
    %cst_17 = arith.constant dense<0.000000e+00> : vector<8x16xf32>
    %37 = vector.multi_reduction <add>, %36, %cst_17 [0] : vector<8x8x16xf32> to vector<8x16xf32>
    %cst_18 = arith.constant dense<0.000000e+00> : vector<8xf32>
    %38 = vector.multi_reduction <add>, %37, %cst_18 [1] : vector<8x16xf32> to vector<8xf32>
    %39 = vector.shape_cast %38 : vector<8xf32> to vector<8x1xf32>
    %cst_19 = arith.constant 0.000000e+00 : f32
    %40 = vector.broadcast %cst_19 : f32 to vector<8x1xf32>
    %41 = arith.subf %40, %39 : vector<8x1xf32>
    %c0_20 = arith.constant 0 : index
    %c0_21 = arith.constant 0 : index
    %42 = vector.load %arg9[%c0_20, %c0_21] : memref<8x1xf32, #tpu.memory_space<vmem>>, vector<8x1xf32>
    tpu.vector_store %arg9[%c0_20, %c0_21], %41 {strides = array<i32>} : memref<8x1xf32, #tpu.memory_space<vmem>>, vector<8x1xf32>,
    return
  }
  func.func @transform_0(%arg0: i32, %arg1: memref<1xf32, #tpu.memory_space<smem>>) -> (i32, i32) {
    %c0_i32 = arith.constant 0 : i32
    %c0_i32_0 = arith.constant 0 : i32
    %c0_i32_1 = arith.constant 0 : i32
    return %c0_i32, %c0_i32_0 : i32, i32
  }
  func.func @transform_1(%arg0: i32, %arg1: memref<1xf32, #tpu.memory_space<smem>>) -> (i32, i32) {
    %c0_i32 = arith.constant 0 : i32
    %c0_i32_0 = arith.constant 0 : i32
    %c0_i32_1 = arith.constant 0 : i32
    return %c0_i32, %c0_i32_0 : i32, i32
  }
  func.func @transform_2(%arg0: i32, %arg1: memref<1xf32, #tpu.memory_space<smem>>) -> (i32, i32) {
    %c0_i32 = arith.constant 0 : i32
    %c0_i32_0 = arith.constant 0 : i32
    %c0_i32_1 = arith.constant 0 : i32
    return %c0_i32, %c0_i32_0 : i32, i32
  }
  func.func @transform_3(%arg0: i32, %arg1: memref<1xf32, #tpu.memory_space<smem>>) -> (i32, i32) {
    %c0_i32 = arith.constant 0 : i32
    %c0_i32_0 = arith.constant 0 : i32
    %c0_i32_1 = arith.constant 0 : i32
    return %c0_i32, %c0_i32_0 : i32, i32
  }
  func.func @transform_4(%arg0: i32, %arg1: memref<1xf32, #tpu.memory_space<smem>>) -> (i32, i32) {
    %c0_i32 = arith.constant 0 : i32
    %c0_i32_0 = arith.constant 0 : i32
    %c0_i32_1 = arith.constant 0 : i32
    return %c0_i32, %c0_i32_0 : i32, i32
  }
  func.func @transform_5(%arg0: i32, %arg1: memref<1xf32, #tpu.memory_space<smem>>) -> (i32, i32) {
    %c0_i32 = arith.constant 0 : i32
    %c0_i32_0 = arith.constant 0 : i32
    %c0_i32_1 = arith.constant 0 : i32
    return %c0_i32, %c0_i32_0 : i32, i32
  }
  func.func @transform_6(%arg0: i32, %arg1: memref<1xf32, #tpu.memory_space<smem>>) -> (i32, i32) {
    %c0_i32 = arith.constant 0 : i32
    %c0_i32_0 = arith.constant 0 : i32
    %c0_i32_1 = arith.constant 0 : i32
    return %c0_i32, %c0_i32_0 : i32, i32
  }
  func.func @transform_7(%arg0: i32, %arg1: memref<1xf32, #tpu.memory_space<smem>>) -> (i32, i32) {
    %c0_i32 = arith.constant 0 : i32
    %c0_i32_0 = arith.constant 0 : i32
    %c0_i32_1 = arith.constant 0 : i32
    return %c0_i32, %c0_i32_0 : i32, i32
  }
}

</mosaic_0001>

<bundles_post_ra>
// kernel: tpu_custom_call.1
= control target key start
LH: loop header
LB: loop body
LE: loop exit
PB: predicated region body
PF: predicated region fallthrough
CT: control target
= control target key end

     0   :  { %v555_v2 = vmov 0.0|0.0   ;;  %vm556_vm0 = vmmov 0   ;;  %v557_v4 = vmov 0.0   ;;  %vm44_vm1 = vcmask 130048   ;;  %s772_s0 = inlined_call_operand.<no memory space> [shape: f32[1], index: 0, kind: input, shape index: {}]   ;;  %s773_s1 = inlined_call_operand.vmem [shape: f32[72,16], index: 1, kind: input, shape index: {}]   ;;  %s774_s2 = inlined_call_operand.vmem [shape: f32[16,32], index: 2, kind: input, shape index: {}]   ;;  %s775_s3 = inlined_call_operand.vmem [shape: f32[1,32], index: 3, kind: input, shape index: {}]   ;;  %s776_s4 = inlined_call_operand.vmem [shape: f32[1,32], index: 4, kind: input, shape index: {}]   ;;  %s777_s5 = inlined_call_operand.vmem [shape: f32[32,16], index: 5, kind: input, shape index: {}]   ;;  %s778_s6 = inlined_call_operand.vmem [shape: f32[1,16], index: 6, kind: input, shape index: {}]   ;;  %s779_s7 = inlined_call_operand.hbm [shape: f32[8,16], index: 7, kind: output, shape index: {0}]   ;;  %s780_s8 = inlined_call_operand.vmem [shape: f32[8,1], index: 8, kind: output, shape index: {1}]  }
   0x1   :  { %v38_v0 = vld [vmem:[%s774_s2] sm:$0xff]  ;;  %v39_v1 = vld [vmem:[%s774_s2 + $0x8] sm:$0xff]  ;;  %516 = vmatprep.subr.bf16.mxu0 %v555_v2  ;;  %454 = vmatprep.mubr.msk.f32.mxu0 %vm556_vm0, %v557_v4 }
   0x2   :  { %v517_v3 = vpack.c.bf16 %v39_v1, %v38_v0  ;;  %519 = vmatprep.subr.bf16.mxu1 %v555_v2  ;;  %489 = vmatprep.mubr.msk.f32.mxu1 %vm556_vm0, %v557_v4  ;;  %v29_v5 = vld [vmem:[%s773_s1] sm:$0xff] }
   0x4   :  { %518 = vmatpush3.bf16.msra.mxu0 %v517_v3 }
   0x5   :  { %15 = vsyncpa [#allocation5], 0  ;;  %v623_v6 = vld [vmem:[%s773_s1 + $0x8] sm:$0xff]  ;;  %v632_v7 = vld [vmem:[%s773_s1 + $0x10] sm:$0xff]  ;;  %v194_v20 = vlaneseq  ;;  %v191_v23 = vstv %s772_s0  ;;  %vm212_vm2 = vcmask 261120  }
   0x6   :  { %v641_v8 = vld [vmem:[%s773_s1 + $0x18] sm:$0xff]  ;;  %v650_v9 = vld [vmem:[%s773_s1 + $0x20] sm:$0xff]  ;;  %v659_v10 = vld [vmem:[%s773_s1 + $0x28] sm:$0xff] }
   0x7   :  { %455 = vmatmul.mubr.msk.f32.vlgmr.msra.gmra.mrb[0].mxu0 %vm44_vm1, %v29_v5  ;;  %v668_v11 = vld [vmem:[%s773_s1 + $0x30] sm:$0xff]  ;;  %v677_v12 = vld [vmem:[%s773_s1 + $0x38] sm:$0xff]  ;;  %v686_v13 = vld [vmem:[%s773_s1 + $0x40] sm:$0xff]  ;;  %v195_v21 = vshrl.u32 %v194_v20, 7 }
   0x8   :  { %457 = vmatprep.mubr.msk.f32.mxu0 %vm556_vm0, %v557_v4  ;;  %v40_v14 = vld [vmem:[%s777_s5] sm:$0xff]  ;;  %v41_v15 = vld [vmem:[%s777_s5 + $0x8] sm:$0xff]  ;;  %v42_v17 = vld [vmem:[%s777_s5 + $0x10] sm:$0xff] }
   0x9   :  { %v520_v16 = vpack.c.bf16 %v41_v15, %v40_v14  ;;  %v43_v18 = vld [vmem:[%s777_s5 + $0x18] sm:$0xff]  ;;  %v190_v22 = vld [vmem:[%s776_s4] sm:$0x1]  ;;  %v196_v25 = vsub.s32 0, %v195_v21  ;;  %s558_s4 = smov [#allocation4]  }
   0xa   :  { %v523_v19 = vpack.c.bf16 %v43_v18, %v42_v17  ;;  %v192_v24 = vmul.f32 %v191_v23, %v190_v22  ;;  %v415_v26 = vld [vmem:[%s775_s3] ss:$0 sm:$0xff]  ;;  %s394_s5 = sshll.u32 %s558_s4, 4  ;;  %s395_s5 = int_to_ptr.vmem [resolvable:$true] %s394_s5 }
   0xb   :  { %458 = vmatmul.mubr.msk.f32.gmra.mrb[2].mxu0 %vm44_vm1, %v623_v6  ;;  %521 = vmatpush3.bf16.msra.mxu1 %v520_v16  ;;  %v425_v60 = vld [vmem:[%s778_s6] ss:$0 sm:$0xff]  ;;  %s531_s6 = scalar_lea.vmem %s395_s5, 128  ;;  %p536_p1 = scmp.lt.s32.totalorder %s395_s5, %s395_s5 }
   0xc   :  { %460 = vmatprep.mubr.msk.f32.mxu0 %vm556_vm0, %v557_v4  ;;  %522 = vmatprep.subr.bf16.mxu1 %v555_v2  ;;  %v197_v27 = vrot.slane %v192_v24, %v196_v25  ;;  %p532_p0 = scmp.ne.s32.totalorder %s395_s5, %s531_s6  ;;  %p537_p2 = scmp.lt.s32.totalorder %s531_s6, %s531_s6 }
   0xe   :  { %p538_p3 = por %p537_p2, %p536_p1 }
   0xf   :  { %461 = vmatmul.mubr.msk.f32.gmra.mrb[4].mxu0 %vm44_vm1, %v632_v7  ;;  %524 = vmatpush3.bf16.msra.mxu1 %v523_v19 }
  0x10   :  { %463 = vmatprep.mubr.msk.f32.mxu0 %vm556_vm0, %v557_v4  ;;  %p539_p4 = pnand %p538_p3, %p532_p0 }
  0x13   :  { %464 = vmatmul.mubr.msk.f32.gmra.mrb[6].mxu0 %vm44_vm1, %v641_v8 }
  0x14   :  { %466 = vmatprep.mubr.msk.f32.mxu0 %vm556_vm0, %v557_v4 }
  0x17   :  { %467 = vmatmul.mubr.msk.f32.gmra.mrb[8].mxu0 %vm44_vm1, %v650_v9 }
  0x18   :  { %469 = vmatprep.mubr.msk.f32.mxu0 %vm556_vm0, %v557_v4 }
  0x1b   :  { %470 = vmatmul.mubr.msk.f32.gmra.mrb[10].mxu0 %vm44_vm1, %v659_v10 }
  0x1c   :  { %472 = vmatprep.mubr.msk.f32.mxu0 %vm556_vm0, %v557_v4 }
  0x1f   :  { %473 = vmatmul.mubr.msk.f32.gmra.mrb[12].mxu0 %vm44_vm1, %v668_v11 }
  0x20   :  { %475 = vmatprep.mubr.msk.f32.mxu0 %vm556_vm0, %v557_v4 }
  0x23   :  { %476 = vmatmul.mubr.msk.f32.gmra.mrb[14].mxu0 %vm44_vm1, %v677_v12 }
  0x24   :  { %478 = vmatprep.mubr.msk.f32.mxu0 %vm556_vm0, %v557_v4 }
  0x27   :  { %479 = vmatmul.mubr.msk.f32.gmra.mrb[16].mxu0 %vm44_vm1, %v686_v13 }
  0xda   :  { %v138_v28 = vpop.f32.mrb[0].mxu0 }
  0xdb   :  { %v189_v29 = vadd.f32 %v415_v26, %v138_v28  ;;  %v456_v30 = vpop.f32.mrb[1].mxu0 }
  0xdd   :  { %v199_v31 = vadd.f32 %v197_v27, %v189_v29 }
  0xde   :  { %v143_v32 = vpop.f32.mrb[2].mxu0 }
  0xdf   :  { %529 = vtanh.f32 %v199_v31  ;;  %v459_v33 = vpop.f32.mrb[3].mxu0 }
  0xe2   :  { %v148_v34 = vpop.f32.mrb[4].mxu0 }
  0xe3   :  { %v462_v35 = vpop.f32.mrb[5].mxu0 }
  0xe6   :  { %v153_v36 = vpop.f32.mrb[6].mxu0 }
  0xe7   :  { %v465_v37 = vpop.f32.mrb[7].mxu0 }
  0xe9   :  { %v530_v38 = vpop.eup %529 }
  0xea   :  { %v201_v39 = vmul.f32 %v530_v38, %v530_v38  ;;  %490 = vmatmul.mubr.msk.f32.vlgmr.msra.gmra.mrb[0].mxu1 %vm212_vm2, %v530_v38  ;;  %v158_v40 = vpop.f32.mrb[8].mxu0 }
  0xeb   :  { %v468_v41 = vpop.f32.mrb[9].mxu0  ;;  %492 = vmatprep.mubr.msk.f32.mxu1 %vm556_vm0, %v557_v4 }
  0xec   :  { %v202_v42 = vsub.f32 1.0, %v201_v39 }
  0xee   :  { %v203_v43 = vmul.f32 0.125, %v202_v42  ;;  %v163_v44 = vpop.f32.mrb[10].mxu0 }
  0xef   :  { %v471_v45 = vpop.f32.mrb[11].mxu0 }
  0xf0   :  { %v204_v46 = vmul.f32 %v203_v43, %v143_v32  ;;  %v205_v47 = vmul.f32 %v203_v43, %v148_v34  ;;  %v206_v48 = vmul.f32 %v203_v43, %v153_v36  ;;  %v207_v49 = vmul.f32 %v203_v43, %v158_v40 }
  0xf1   :  { %v208_v50 = vmul.f32 %v203_v43, %v163_v44 }
  0xf2   :  { %v168_v51 = vpop.f32.mrb[12].mxu0  ;;  %493 = vmatmul.mubr.msk.f32.gmra.mrb[2].mxu1 %vm212_vm2, %v204_v46 }
  0xf3   :  { %v209_v52 = vmul.f32 %v203_v43, %v168_v51  ;;  %v474_v53 = vpop.f32.mrb[13].mxu0  ;;  %495 = vmatprep.mubr.msk.f32.mxu1 %vm556_vm0, %v557_v4 }
  0xf6   :  { %v173_v54 = vpop.f32.mrb[14].mxu0  ;;  %496 = vmatmul.mubr.msk.f32.gmra.mrb[4].mxu1 %vm212_vm2, %v205_v47 }
  0xf7   :  { %v210_v55 = vmul.f32 %v203_v43, %v173_v54  ;;  %v477_v56 = vpop.f32.mrb[15].mxu0  ;;  %498 = vmatprep.mubr.msk.f32.mxu1 %vm556_vm0, %v557_v4 }
  0xfa   :  { %v178_v57 = vpop.f32.mrb[16].mxu0  ;;  %499 = vmatmul.mubr.msk.f32.gmra.mrb[6].mxu1 %vm212_vm2, %v206_v48 }
  0xfb   :  { %v211_v58 = vmul.f32 %v203_v43, %v178_v57  ;;  %501 = vmatprep.mubr.msk.f32.mxu1 %vm556_vm0, %v557_v4  ;;  %v480_v59 = vpop.f32.mrb[17].mxu0 }
  0xfe   :  { %502 = vmatmul.mubr.msk.f32.gmra.mrb[8].mxu1 %vm212_vm2, %v207_v49 }
  0xff   :  { %504 = vmatprep.mubr.msk.f32.mxu1 %vm556_vm0, %v557_v4 }
 0x102   :  { %505 = vmatmul.mubr.msk.f32.gmra.mrb[10].mxu1 %vm212_vm2, %v208_v50 }
 0x103   :  { %507 = vmatprep.mubr.msk.f32.mxu1 %vm556_vm0, %v557_v4 }
 0x106   :  { %508 = vmatmul.mubr.msk.f32.gmra.mrb[12].mxu1 %vm212_vm2, %v209_v52 }
 0x107   :  { %510 = vmatprep.mubr.msk.f32.mxu1 %vm556_vm0, %v557_v4 }
 0x10a   :  { %511 = vmatmul.mubr.msk.f32.gmra.mrb[14].mxu1 %vm212_vm2, %v210_v55 }
 0x10b   :  { %513 = vmatprep.mubr.msk.f32.mxu1 %vm556_vm0, %v557_v4 }
 0x10e   :  { %514 = vmatmul.mubr.msk.f32.gmra.mrb[16].mxu1 %vm212_vm2, %v211_v58 }
 0x1bd   :  { %v306_v61 = vpop.f32.mrb[0].mxu1 }
 0x1be   :  { %v357_v62 = vadd.f32 %v425_v60, %v306_v61  ;;  %v491_v63 = vpop.f32.mrb[1].mxu1 }
 0x1c0   :  { %358 = vst.msk [vmem:[#allocation4] sm:$0xff] %vm44_vm1, %v357_v62 }
 0x1c5   :  { %v311_v0 = vpop.f32.mrb[2].mxu1 }
 0x1c6   :  { %v494_v1 = vpop.f32.mrb[3].mxu1  ;;  %v359_v2 = vmul.f32 %v311_v0, %v623_v6 }
 0x1c8   :  { %v367_v4 = vsel %vm44_vm1, %v359_v2, 0.0 }
 0x1c9   :  { %v316_v3 = vpop.f32.mrb[4].mxu1 }
 0x1ca   :  { %v360_v5 = vmul.f32 %v316_v3, %v632_v7  ;;  %v497_v14 = vpop.f32.mrb[5].mxu1 }
 0x1cc   :  { %v368_v15 = vsel %vm44_vm1, %v360_v5, 0.0 }
 0x1cd   :  { %v369_v16 = vadd.f32 %v368_v15, %v367_v4  ;;  %v321_v17 = vpop.f32.mrb[6].mxu1 }
 0x1ce   :  { %v361_v18 = vmul.f32 %v321_v17, %v641_v8  ;;  %v500_v19 = vpop.f32.mrb[7].mxu1 }
 0x1d0   :  { %v370_v20 = vsel %vm44_vm1, %v361_v18, 0.0 }
 0x1d1   :  { %v371_v21 = vadd.f32 %v370_v20, %v369_v16  ;;  %v326_v22 = vpop.f32.mrb[8].mxu1 }
 0x1d2   :  { %v362_v23 = vmul.f32 %v326_v22, %v650_v9  ;;  %v503_v6 = vpop.f32.mrb[9].mxu1 }
 0x1d4   :  { %v372_v24 = vsel %vm44_vm1, %v362_v23, 0.0 }
 0x1d5   :  { %v373_v7 = vadd.f32 %v372_v24, %v371_v21  ;;  %v331_v25 = vpop.f32.mrb[10].mxu1 }
 0x1d6   :  { %v363_v26 = vmul.f32 %v331_v25, %v659_v10  ;;  %v506_v27 = vpop.f32.mrb[11].mxu1 }
 0x1d8   :  { %v374_v28 = vsel %vm44_vm1, %v363_v26, 0.0 }
 0x1d9   :  { %v375_v29 = vadd.f32 %v374_v28, %v373_v7  ;;  %v336_v30 = vpop.f32.mrb[12].mxu1 }
 0x1da   :  { %v364_v8 = vmul.f32 %v336_v30, %v668_v11  ;;  %v509_v31 = vpop.f32.mrb[13].mxu1 }
 0x1dc   :  { %v376_v32 = vsel %vm44_vm1, %v364_v8, 0.0 }
 0x1dd   :  { %v377_v33 = vadd.f32 %v376_v32, %v375_v29  ;;  %v341_v34 = vpop.f32.mrb[14].mxu1 }
 0x1de   :  { %v365_v9 = vmul.f32 %v341_v34, %v677_v12  ;;  %v512_v35 = vpop.f32.mrb[15].mxu1 }
 0x1e0   :  { %v378_v36 = vsel %vm44_vm1, %v365_v9, 0.0 }
 0x1e1   :  { %v379_v37 = vadd.f32 %v378_v36, %v377_v33  ;;  %v346_v38 = vpop.f32.mrb[16].mxu1 }
 0x1e2   :  { %v366_v10 = vmul.f32 %v346_v38, %v686_v13  ;;  %v515_v39 = vpop.f32.mrb[17].mxu1 }
 0x1e4   :  { %v380_v40 = vsel %vm44_vm1, %v366_v10, 0.0 }
 0x1e5   :  { %v381_v41 = vadd.f32 %v380_v40, %v379_v37 }
 0x1e7   :  { %v382_v11 = vsel %vm44_vm1, %v381_v41, 0.0 }
 0x1e8   :  { %383 = vadd.xlane.f32.xlu0 %v382_v11 }
 0x1e9   :  { %542 = shalt.err (!%p539_p4)
}
 0x1ea   :  { %s543_s18 = scalar_lea.hbm %s779_s7, 128 }
 0x1eb   :  { %p544_p5 = scmp.ne.s32.totalorder %s779_s7, %s543_s18  ;;  %p547_p6 = scmp.lt.u32.totalorder %s543_s18, %s779_s7 }
 0x1ed   :  { %p549_p7 = pnand %p547_p6, %p544_p5 }
 0x1ef   :  { %552 = shalt.err (!%p549_p7)
}
 0x1f0   :  { %397 = dma.vmem_to_hbm [thread:$0]  %s395_s5, 128, %s779_s7, [#allocation5]   ;;  %vm386_vm3 = vcmask 7168  }
 0x275   :  { %v384_v12 = vpop.xlane.xlu0 %383 }
 0x276   :  { %v385_v13 = vsub.f32 0.0, %v384_v12 }
 0x278   :  { %387 = vst.msk [vmem:[%s780_s8] sm:$0xff] %vm386_vm3, %v385_v13 }
 0x279   :  { %553 = dma.done.wait [#allocation5], 128  }
 0x27a   :  { %554 = vsyncadd [#allocation5], 4294967168 }
 0x27b   :  { %405 = vsyncpa [#allocation5], 1 }

</bundles_post_ra>
